<compile_context>
chip_gen: v5e
topology: v5e:2x2
jax: 0.10.0
libtpu: 0.0.40
codegen_flags: <defaults>
</compile_context>

<pallas_src>
import functools

import jax
import jax.numpy as jnp
from jax.experimental import pallas as pl
from jax.experimental.pallas import tpu as pltpu

DROP_P = 0.3


def _round_up(n: int, m: int) -> int:
    return ((n + m - 1) // m) * m


def _choose_tiles(B: int, IN: int, OUT: int):
    # Sublane-aligned M tile; lane-dense (multiple of 128) K/N tiles.
    # Worst case (256, 512, 256) f32 double-buffered ~= 4 MiB live: fits every
    # generation including v7x's 64 MiB VMEM.
    tm = min(_round_up(B, 8), 256)
    tk = min(_round_up(IN, 128), 512)
    tn = min(_round_up(OUT, 128), 256)
    return tm, tk, tn


def _dropout_linear_kernel(*refs, p: float, training: bool, single_k: bool):
    use_dropout = bool(training) and p > 0.0
    if use_dropout:
        bits_ref, *rest = refs
    else:
        bits_ref = None
        rest = list(refs)

    if single_k:
        x_ref, w_ref, b_ref, o_ref = rest
        acc_ref = None
    else:
        x_ref, w_ref, b_ref, o_ref, acc_ref = rest

    x = x_ref[...]
    if use_dropout:
        threshold = jnp.uint32(int(p * (2.0 ** 32)))
        keep = bits_ref[...] >= threshold             # keep prob = 1 - p
        x = jnp.where(keep, x, jnp.zeros_like(x))     # rescale folded into epilogue

    # Weight tile is [tn, tk] (PyTorch [OUT, IN] layout); contract last dims,
    # so no transpose copy is ever materialized.
    partial = jax.lax.dot_general(
        x, w_ref[...],
        dimension_numbers=(((1,), (1,)), ((), ())),
        preferred_element_type=jnp.float32)

    scale = jnp.float32(1.0 / (1.0 - p)) if use_dropout else None

    if single_k:
        out = partial * scale if scale is not None else partial
        o_ref[...] = (out + b_ref[...]).astype(o_ref.dtype)
    else:
        k = pl.program_id(2)

        @pl.when(k == 0)
        def _():
            acc_ref[...] = jnp.zeros_like(acc_ref)

        acc_ref[...] += partial

        @pl.when(k == pl.num_programs(2) - 1)
        def _():
            acc = acc_ref[...]
            if scale is not None:
                acc = acc * scale
            o_ref[...] = (acc + b_ref[...]).astype(o_ref.dtype)


def model_forward(x, weight, bias, *, key=None, p=DROP_P, training=True):
    """x: [B, IN] f32; weight: [OUT, IN] f32 (PyTorch layout); bias: [OUT] f32."""
    B, IN = x.shape
    OUT, IN_w = weight.shape
    assert IN_w == IN, "weight must be [OUT, IN]"

    tm, tk, tn = _choose_tiles(B, IN, OUT)
    Bp, INp, OUTp = _round_up(B, tm), _round_up(IN, tk), _round_up(OUT, tn)
    nk = INp // tk
    single_k = nk == 1

    use_dropout = bool(training) and p > 0.0

    # Zero-pad to tile multiples (lane-dense stores for small OUT).
    # TODO(synk): in a real model, pre-pad weight/bias once outside the hot path.
    xp = x if (Bp, INp) == (B, IN) else jnp.pad(x, ((0, Bp - B), (0, INp - IN)))
    wp = weight if (OUTp, INp) == (OUT, IN) else jnp.pad(
        weight, ((0, OUTp - OUT), (0, INp - IN)))
    bp = bias if OUTp == OUT else jnp.pad(bias, (0, OUTp - OUT))
    bp = bp.reshape(1, OUTp)

    args = []
    in_specs = []
    if use_dropout:
        assert key is not None, "training dropout needs a PRNG key"
        bits = jax.random.bits(key, (B, IN), dtype=jnp.uint32)
        if (Bp, INp) != (B, IN):
            bits = jnp.pad(bits, ((0, Bp - B), (0, INp - IN)))
        args.append(bits)
        # Mask depends only on the (i, k) x-tile -> identical across all N tiles.
        in_specs.append(pl.BlockSpec((tm, tk), lambda i, j, k: (i, k)))

    args += [xp, wp, bp]
    in_specs += [
        pl.BlockSpec((tm, tk), lambda i, j, k: (i, k)),   # x
        pl.BlockSpec((tn, tk), lambda i, j, k: (j, k)),   # weight [OUT, IN]
        pl.BlockSpec((1, tn), lambda i, j, k: (0, j)),    # bias row
    ]

    kernel = functools.partial(
        _dropout_linear_kernel, p=p, training=training, single_k=single_k)

    scratch_shapes = [] if single_k else [pltpu.VMEM((tm, tn), jnp.float32)]

    out_p = pl.pallas_call(
        kernel,
        out_shape=jax.ShapeDtypeStruct((Bp, OUTp), x.dtype),
        grid_spec=pltpu.PrefetchScalarGridSpec(
            num_scalar_prefetch=0,
            grid=(Bp // tm, OUTp // tn, nk),
            in_specs=in_specs,
            out_specs=pl.BlockSpec((tm, tn), lambda i, j, k: (i, j)),
            scratch_shapes=scratch_shapes,
        ),
        compiler_params=pltpu.CompilerParams(
            dimension_semantics=("parallel", "parallel", "arbitrary"),
            vmem_limit_bytes=32 * 1024 * 1024),
    )(*args)

    return out_p[:B, :OUT]


if __name__ == "__main__":
    # Small shapes consistent with the module: batch=8, input_shape=32, output_shape=16
    B, IN, OUT = 8, 32, 16

    root = jax.random.PRNGKey(0)
    kx, kw, kb, kdrop = jax.random.split(root, 4)

    x = jax.random.normal(kx, (B, IN), dtype=jnp.float32)
    bound = 1.0 / (IN ** 0.5)
    weight = jax.random.uniform(kw, (OUT, IN), minval=-bound, maxval=bound,
                                dtype=jnp.float32)
    bias = jax.random.uniform(kb, (OUT,), minval=-bound, maxval=bound,
                              dtype=jnp.float32)

    # --- eval mode (dropout = identity): check against pure-JAX reference ---
    out_eval = model_forward(x, weight, bias, training=False)
    jax.block_until_ready(out_eval)
    ref_eval = jnp.dot(x, weight.T, precision=jax.lax.Precision.HIGHEST) + bias
    assert out_eval.shape == (B, OUT)
    assert jnp.allclose(out_eval, ref_eval, atol=1e-3, rtol=1e-3), "eval mismatch"

    # --- train mode: reproduce the same dropout bits for the reference ---
    out_train = model_forward(x, weight, bias, key=kdrop, training=True)
    jax.block_until_ready(out_train)
    bits = jax.random.bits(kdrop, (B, IN), dtype=jnp.uint32)
    keep = bits >= jnp.uint32(int(DROP_P * (2.0 ** 32)))
    xm = jnp.where(keep, x, 0.0)
    ref_train = (jnp.dot(xm, weight.T, precision=jax.lax.Precision.HIGHEST)
                 * jnp.float32(1.0 / (1.0 - DROP_P)) + bias)
    assert out_train.shape == (B, OUT)
    assert jnp.allclose(out_train, ref_train, atol=1e-3, rtol=1e-3), "train mismatch"

    print("KERNEL_OK")
</pallas_src>

<mosaic_0001>
module attributes {stable_mosaic.version = 11 : i64} {
  func.func @_dropout_linear_kernel(%arg0: i32, %arg1: i32, %arg2: i32, %arg3: memref<8x128xf32, #tpu.memory_space<vmem>>, %arg4: memref<128x128xf32, #tpu.memory_space<vmem>>, %arg5: memref<1x128xf32, #tpu.memory_space<vmem>>, %arg6: memref<8x128xf32, #tpu.memory_space<vmem>>) attributes {dimension_semantics = [#tpu.dimension_semantics<parallel>, #tpu.dimension_semantics<parallel>, #tpu.dimension_semantics<arbitrary>], iteration_bounds = array<i64: 1, 1, 1>, scalar_prefetch = 0 : i64, scratch_operands = 0 : i64, tpu.core_type = #tpu.core_type<tc>, window_params = [{transform_indices = @transform_0, window_bounds = array<i64: 8, 128>}, {transform_indices = @transform_1, window_bounds = array<i64: 128, 128>}, {transform_indices = @transform_2, window_bounds = array<i64: 1, 128>}, {transform_indices = @transform_3, window_bounds = array<i64: 8, 128>}]} {
    %c0 = arith.constant 0 : index
    %c0_0 = arith.constant 0 : index
    %0 = vector.load %arg3[%c0, %c0_0] : memref<8x128xf32, #tpu.memory_space<vmem>>, vector<8x128xf32>
    %c0_1 = arith.constant 0 : index
    %c0_2 = arith.constant 0 : index
    %1 = vector.load %arg4[%c0_1, %c0_2] : memref<128x128xf32, #tpu.memory_space<vmem>>, vector<128x128xf32>
    %cst = arith.constant dense<0.000000e+00> : vector<8x128xf32>
    %2 = tpu.matmul %0, %1, %cst {dimension_numbers = #tpu.dot_dimension_numbers<[1], [1], [0], [0], [0, 0, 1, 0], [], []>} : vector<8x128xf32>, vector<128x128xf32>, vector<8x128xf32> -> vector<8x128xf32>
    %c0_3 = arith.constant 0 : index
    %c0_4 = arith.constant 0 : index
    %3 = vector.load %arg5[%c0_3, %c0_4] : memref<1x128xf32, #tpu.memory_space<vmem>>, vector<1x128xf32>
    %4 = vector.broadcast %3 : vector<1x128xf32> to vector<8x128xf32>
    %5 = arith.addf %2, %4 : vector<8x128xf32>
    %c0_5 = arith.constant 0 : index
    %c0_6 = arith.constant 0 : index
    %6 = vector.load %arg6[%c0_5, %c0_6] : memref<8x128xf32, #tpu.memory_space<vmem>>, vector<8x128xf32>
    tpu.vector_store %arg6[%c0_5, %c0_6], %5 {strides = array<i32>} : memref<8x128xf32, #tpu.memory_space<vmem>>, vector<8x128xf32>,
    return
  }
  func.func @transform_0(%arg0: i32, %arg1: i32, %arg2: i32) -> (i32, i32) {
    %c0_i32 = arith.constant 0 : i32
    return %arg0, %arg2 : i32, i32
  }
  func.func @transform_1(%arg0: i32, %arg1: i32, %arg2: i32) -> (i32, i32) {
    %c0_i32 = arith.constant 0 : i32
    return %arg1, %arg2 : i32, i32
  }
  func.func @transform_2(%arg0: i32, %arg1: i32, %arg2: i32) -> (i32, i32) {
    %c0_i32 = arith.constant 0 : i32
    %c0_i32_0 = arith.constant 0 : i32
    return %c0_i32, %arg1 : i32, i32
  }
  func.func @transform_3(%arg0: i32, %arg1: i32, %arg2: i32) -> (i32, i32) {
    %c0_i32 = arith.constant 0 : i32
    return %arg0, %arg1 : i32, i32
  }
}

</mosaic_0001>

<bundles_post_ra>
// kernel: tpu_custom_call.1
= control target key start
LH: loop header
LB: loop body
LE: loop exit
PB: predicated region body
PF: predicated region fallthrough
CT: control target
= control target key end

     0   :  { %8 = vsyncpa [#allocation3], 0  ;;  %s226_s0 = inlined_call_operand.hbm [shape: f32[8,128], index: 0, kind: input, shape index: {}]   ;;  %s227_s1 = inlined_call_operand.hbm [shape: f32[128,128], index: 1, kind: input, shape index: {}]   ;;  %s228_s2 = inlined_call_operand.vmem [shape: f32[1,128], index: 2, kind: input, shape index: {}]   ;;  %s229_s3 = inlined_call_operand.hbm [shape: f32[8,128], index: 3, kind: output, shape index: {}]  }
   0x1   :  { %9 = vsyncpa [#allocation6], 0 }
   0x2   :  { %10 = vsyncpa [#allocation4], 0  ;;  %s16_s14 = sshll.u32 %s226_s0, 4  ;;  %s189_s15 = smov [#allocation2]   ;;  %s17_s14 = int_to_ptr.hbm [resolvable:$true] %s16_s14 }
   0x3   :  { %s18_s16 = sshll.u32 %s189_s15, 4  ;;  %s26_s19 = sshll.u32 %s227_s1, 4  ;;  %s19_s16 = int_to_ptr.vmem [resolvable:$true] %s18_s16  ;;  %s27_s19 = int_to_ptr.hbm [resolvable:$true] %s26_s19 }
   0x4   :  { %21 = dma.hbm_to_vmem [thread:$0]  %s17_s14, 128, %s19_s16, [#allocation3]  }
   0x5   :  { %s190_s20 = smov [#allocation5]   ;;  %s191_s22 = smov 128  }
   0x6   :  { %s28_s21 = sshll.u32 %s190_s20, 4  ;;  %s192_s23 = smov 8   ;;  %s29_s21 = int_to_ptr.vmem [resolvable:$true] %s28_s21 }
   0x7   :  { %34 = dma.hbm_to_vmem [thread:$0]  %s27_s19, 2048, %s29_s21, [#allocation6], %s191_s22, %s191_s22, %s192_s23  }
   0x8   :  { %183 = dma.done.wait [#allocation3], 128  }
   0x9   :  { %184 = vsyncadd [#allocation3], 4294967168 }
   0xa   :  { %185 = dma.done.wait [#allocation6], 2048  }
   0xb   :  { %186 = vsyncadd [#allocation6], 4294965248  ;;  %v61_v0 = vld [vmem:[#allocation5 + $0x78] sm:$0xff]  ;;  %v60_v1 = vld [vmem:[#allocation5 + $0x70] sm:$0xff]  ;;  %s193_s24 = smov [#allocation7]   ;;  %s94_s28 = sshll.u32 %s229_s3, 4  ;;  %s95_s28 = int_to_ptr.hbm [resolvable:$true] %s94_s28 }
   0xc   :  { %66 = vmatpush.xpose.msra.mxu0 %v61_v0  ;;  %v59_v2 = vld [vmem:[#allocation5 + $0x68] sm:$0xff]  ;;  %v58_v3 = vld [vmem:[#allocation5 + $0x60] sm:$0xff]  ;;  %v57_v4 = vld [vmem:[#allocation5 + $0x58] sm:$0xff]  ;;  %s92_s25 = sshll.u32 %s193_s24, 4  ;;  %s93_s25 = int_to_ptr.vmem [resolvable:$true] %s92_s25 }
   0xd   :  { %v56_v5 = vld [vmem:[#allocation5 + $0x50] sm:$0xff]  ;;  %v55_v6 = vld [vmem:[#allocation5 + $0x48] sm:$0xff]  ;;  %v54_v7 = vld [vmem:[#allocation5 + $0x40] sm:$0xff] }
   0xe   :  { %v53_v8 = vld [vmem:[#allocation5 + $0x38] sm:$0xff]  ;;  %v52_v9 = vld [vmem:[#allocation5 + $0x30] sm:$0xff]  ;;  %v51_v10 = vld [vmem:[#allocation5 + $0x28] sm:$0xff] }
   0xf   :  { %v50_v11 = vld [vmem:[#allocation5 + $0x20] sm:$0xff]  ;;  %v49_v12 = vld [vmem:[#allocation5 + $0x18] sm:$0xff]  ;;  %v48_v13 = vld [vmem:[#allocation5 + $0x10] sm:$0xff] }
  0x10   :  { %67 = vmatpush.xpose.msra.mxu0 %v60_v1  ;;  %v47_v14 = vld [vmem:[#allocation5 + $0x8] sm:$0xff]  ;;  %v46_v15 = vld [vmem:[#allocation5] sm:$0xff]  ;;  %v45_v16 = vld [vmem:[#allocation2] sm:$0xff] }
  0x11   :  { %v110_v17 = vld [vmem:[%s228_s2] ss:$0 sm:$0xff] }
  0x14   :  { %68 = vmatpush.xpose.msra.mxu0 %v59_v2 }
  0x18   :  { %69 = vmatpush.xpose.msra.mxu0 %v58_v3 }
  0x1c   :  { %70 = vmatpush.xpose.msra.mxu0 %v57_v4 }
  0x20   :  { %71 = vmatpush.xpose.msra.mxu0 %v56_v5 }
  0x24   :  { %72 = vmatpush.xpose.msra.mxu0 %v55_v6 }
  0x28   :  { %73 = vmatpush.xpose.msra.mxu0 %v54_v7 }
  0x2c   :  { %74 = vmatpush.xpose.msra.mxu0 %v53_v8 }
  0x30   :  { %75 = vmatpush.xpose.msra.mxu0 %v52_v9 }
  0x34   :  { %76 = vmatpush.xpose.msra.mxu0 %v51_v10 }
  0x38   :  { %77 = vmatpush.xpose.msra.mxu0 %v50_v11 }
  0x3c   :  { %78 = vmatpush.xpose.msra.mxu0 %v49_v12 }
  0x40   :  { %79 = vmatpush.xpose.msra.mxu0 %v48_v13 }
  0x44   :  { %80 = vmatpush.xpose.msra.mxu0 %v47_v14 }
  0x48   :  { %81 = vmatpush.xpose.msra.mxu0 %v46_v15 }
  0x4b   :  { %82 = vmatmul.f32.vlgmr.msra.gmra.mxu0 %v45_v16 }
  0xc8   :  { %v83_v18 = vpop.f32.mrf.mxu0 }
  0xc9   :  { %v84_v19 = vadd.f32 %v110_v17, %v83_v18 }
  0xcb   :  { %86 = vst [vmem:[#allocation7] sm:$0xff] %v84_v19 }
  0xcc   :  { %97 = dma.vmem_to_hbm [thread:$0]  %s93_s25, 128, %s95_s28, [#allocation4]  }
  0xcd   :  { %187 = dma.done.wait [#allocation4], 128  }
  0xce   :  { %188 = vsyncadd [#allocation4], 4294967168 }
  0xcf   :  { %102 = vsyncpa [#allocation3], 1 }
  0xd0   :  { %103 = vsyncpa [#allocation6], 1 }
  0xd1   :  { %104 = vsyncpa [#allocation4], 1 }

</bundles_post_ra>
